<compile_context>
chip_gen: v7x
topology: tpu7x:2x2x1
jax: 0.10.0
libtpu: 0.0.40
codegen_flags: <defaults>
</compile_context>

<pallas_src>
import math

import jax
import jax.numpy as jnp
import numpy as np
from jax.experimental import pallas as pl
from jax.experimental.pallas import tpu as pltpu

# ---- model hyper-parameters (from the PyTorch module) -----------------------
SENTENCES = ['I like toys', 'I love dad', 'I hate getting-hit', 'I believe mom']
WORD_LIST = sorted(set(' '.join(SENTENCES).split()))   # sorted -> deterministic
WORD2IDX = {w: i for i, w in enumerate(WORD_LIST)}
VOC_SIZE = len(WORD_LIST)        # 9
EMB = 2                          # embedding_size
HID = 4                          # n_hidden

# ---- TPU-padded sizes (transposed layout: batch in lanes, features in sublanes)
GS = 8        # per-gate sublane block = padded hidden dim (multiple of 8)
BL = 128      # padded batch (lane dim, multiple of 128)
VP = 16       # padded vocab (sublane dim of the logits, multiple of 8)


def _sigmoid(x):
    return 1.0 / (1.0 + jnp.exp(-x))


# ---- Pallas kernel: LSTM recurrence (recurrent matmul only) + linear head ----
def nplm2_kernel(xg_ref, whh_ref, wout_ref, bout_ref, out_ref):
    # xg_ref:  (T, 4*GS, BL)  precomputed x@W_ih.T + (b_ih+b_hh); gate-major sublanes,
    #                         batch in lanes
    # whh_ref: (4*GS, GS)     recurrent weights (gate-major rows, hidden cols)
    # wout_ref:(VP, GS)       output head weights
    # bout_ref:(VP, 1)        output head bias (broadcast over batch lanes in-kernel)
    # out_ref: (VP, BL)       logits: vocab in sublanes, batch in lanes
    T = xg_ref.shape[0]
    gs = whh_ref.shape[1]        # 8
    bl = xg_ref.shape[2]         # 128

    h = jnp.zeros((gs, bl), jnp.float32)
    c = jnp.zeros((gs, bl), jnp.float32)

    for t in range(T):  # T is a tiny static constant -> fully unrolled
        gates = xg_ref[t] + jnp.dot(whh_ref[...], h,
                                    preferred_element_type=jnp.float32)   # (4*GS, BL)
        # Gate order [i | f | g | o]; each slice is a whole-vreg sublane block.
        i_g = _sigmoid(gates[0 * gs:1 * gs])
        f_g = _sigmoid(gates[1 * gs:2 * gs])
        g_g = jnp.tanh(gates[2 * gs:3 * gs])
        o_g = _sigmoid(gates[3 * gs:4 * gs])
        c = f_g * c + i_g * g_g
        h = o_g * jnp.tanh(c)

    # linear head on the last hidden state (bias broadcast along batch lanes)
    out_ref[...] = (jnp.dot(wout_ref[...], h, preferred_element_type=jnp.float32)
                    + bout_ref[...])


# ---- one-time weight packing (hoisted out of the per-call path) --------------
def pack_params(params):
    """Pack/pad LSTM + head weights into TPU-friendly layouts. Call once."""
    # (4H, H) -> (4, HID, HID) -> pad -> (4*GS, GS): gate k occupies rows [8k, 8k+HID)
    whh_p = jnp.pad(params["w_hh"].reshape(4, HID, HID),
                    ((0, 0), (0, GS - HID), (0, GS - HID))).reshape(4 * GS, GS)
    wout_p = jnp.pad(params["w_lin"], ((0, VP - VOC_SIZE), (0, GS - HID)))   # (VP, GS)
    bout_p = jnp.pad(params["b_lin"], (0, VP - VOC_SIZE)).reshape(VP, 1)     # (VP, 1)
    return {
        "C": params["C"],
        "w_ih": params["w_ih"],
        "b": params["b_ih"] + params["b_hh"],
        "whh_p": whh_p,
        "wout_p": wout_p,
        "bout_p": bout_p,
    }


# ---- per-call wrapper ---------------------------------------------------------
def nplm2_forward(X, packed):
    """X: (B, T) int32 token ids. Returns (B, VOC_SIZE) float32 logits."""
    B, T = X.shape
    assert B <= BL

    # Embedding lookup + input projection: tiny XLA glue (perf-review item 1).
    emb = packed["C"][X]                                   # (B, T, EMB)
    xg = emb @ packed["w_ih"].T + packed["b"]              # (B, T, 4*HID)
    # Repack to (T, 4*GS, BL): gate-major sublane blocks, batch in lanes.
    xg = jnp.transpose(xg, (1, 2, 0)).reshape(T, 4, HID, B)
    xg = jnp.pad(xg, ((0, 0), (0, 0), (0, GS - HID), (0, BL - B)))
    xg = xg.reshape(T, 4 * GS, BL)

    out_pad = pl.pallas_call(
        nplm2_kernel,
        out_shape=jax.ShapeDtypeStruct((VP, BL), jnp.float32),
        grid_spec=pl.GridSpec(
            grid=(1,),
            in_specs=[
                pl.BlockSpec((T, 4 * GS, BL), lambda i: (0, 0, 0)),
                pl.BlockSpec((4 * GS, GS), lambda i: (0, 0)),
                pl.BlockSpec((VP, GS), lambda i: (0, 0)),
                pl.BlockSpec((VP, 1), lambda i: (0, 0)),
            ],
            out_specs=pl.BlockSpec((VP, BL), lambda i: (0, 0)),
        ),
        compiler_params=pltpu.CompilerParams(dimension_semantics=("arbitrary",)),
    )(xg, packed["whh_p"], packed["wout_p"], packed["bout_p"])

    return out_pad[:VOC_SIZE, :B].T                        # (B, VOC_SIZE)


# ---- pure-JAX reference (PyTorch LSTM semantics) ------------------------------
def reference_forward(X, params):
    emb = params["C"][X]                                   # (B, T, E)
    B, T, _ = emb.shape
    H = HID
    h = jnp.zeros((B, H), jnp.float32)
    c = jnp.zeros((B, H), jnp.float32)
    for t in range(T):
        x_t = emb[:, t, :]
        gates = (x_t @ params["w_ih"].T + h @ params["w_hh"].T
                 + params["b_ih"] + params["b_hh"])        # (B, 4H)
        i = _sigmoid(gates[:, 0 * H:1 * H])
        f = _sigmoid(gates[:, 1 * H:2 * H])
        g = jnp.tanh(gates[:, 2 * H:3 * H])
        o = _sigmoid(gates[:, 3 * H:4 * H])
        c = f * c + i * g
        h = o * jnp.tanh(c)
    return h @ params["w_lin"].T + params["b_lin"]


def make_params(key):
    ks = jax.random.split(key, 7)
    bound = 1.0 / math.sqrt(HID)
    return {
        "C": jax.random.normal(ks[0], (VOC_SIZE, EMB), jnp.float32),
        "w_ih": jax.random.uniform(ks[1], (4 * HID, EMB), jnp.float32, -bound, bound),
        "w_hh": jax.random.uniform(ks[2], (4 * HID, HID), jnp.float32, -bound, bound),
        "b_ih": jax.random.uniform(ks[3], (4 * HID,), jnp.float32, -bound, bound),
        "b_hh": jax.random.uniform(ks[4], (4 * HID,), jnp.float32, -bound, bound),
        "w_lin": jax.random.uniform(ks[5], (VOC_SIZE, HID), jnp.float32, -bound, bound),
        "b_lin": jax.random.uniform(ks[6], (VOC_SIZE,), jnp.float32, -bound, bound),
    }


if __name__ == "__main__":
    key = jax.random.PRNGKey(0)
    params = make_params(key)
    packed = pack_params(params)        # one-time packing (perf-review item 3)

    # inputs: first two words of each sentence (classic NPLM setup) -> (4, 2)
    X = jnp.asarray(
        [[WORD2IDX[w] for w in s.split()[:-1]] for s in SENTENCES], dtype=jnp.int32)

    fwd = jax.jit(nplm2_forward)
    out = jax.block_until_ready(fwd(X, packed))

    ref = reference_forward(X, params)
    np.testing.assert_allclose(np.asarray(out), np.asarray(ref), rtol=1e-5, atol=1e-5)
    assert out.shape == (4, VOC_SIZE)

    print("KERNEL_OK")
</pallas_src>

<mosaic_0001>
module attributes {stable_mosaic.version = 11 : i64} {
  func.func @nplm2_kernel(%arg0: i32, %arg1: memref<2x32x128xf32, #tpu.memory_space<vmem>>, %arg2: memref<32x8xf32, #tpu.memory_space<vmem>>, %arg3: memref<16x8xf32, #tpu.memory_space<vmem>>, %arg4: memref<16x1xf32, #tpu.memory_space<vmem>>, %arg5: memref<16x128xf32, #tpu.memory_space<vmem>>) attributes {dimension_semantics = [#tpu.dimension_semantics<arbitrary>], iteration_bounds = array<i64: 1>, scalar_prefetch = 0 : i64, scratch_operands = 0 : i64, tpu.core_type = #tpu.core_type<tc>, window_params = [{pipeline_mode = #tpu.pipeline_mode<synchronous>, transform_indices = @transform_0, window_bounds = array<i64: 2, 32, 128>}, {pipeline_mode = #tpu.pipeline_mode<synchronous>, transform_indices = @transform_1, window_bounds = array<i64: 32, 8>}, {pipeline_mode = #tpu.pipeline_mode<synchronous>, transform_indices = @transform_2, window_bounds = array<i64: 16, 8>}, {pipeline_mode = #tpu.pipeline_mode<synchronous>, transform_indices = @transform_3, window_bounds = array<i64: 16, 1>}, {pipeline_mode = #tpu.pipeline_mode<synchronous>, transform_indices = @transform_4, window_bounds = array<i64: 16, 128>}]} {
    %cst = arith.constant 0.000000e+00 : f32
    %0 = vector.broadcast %cst : f32 to vector<8x128xf32>
    %cst_0 = arith.constant 0.000000e+00 : f32
    %1 = vector.broadcast %cst_0 : f32 to vector<8x128xf32>
    %c0 = arith.constant 0 : index
    %c0_1 = arith.constant 0 : index
    %c0_2 = arith.constant 0 : index
    %2 = vector.load %arg1[%c0, %c0_1, %c0_2] : memref<2x32x128xf32, #tpu.memory_space<vmem>>, vector<1x32x128xf32>
    %3 = vector.shape_cast %2 : vector<1x32x128xf32> to vector<32x128xf32>
    %c0_3 = arith.constant 0 : index
    %c0_4 = arith.constant 0 : index
    %4 = vector.load %arg2[%c0_3, %c0_4] : memref<32x8xf32, #tpu.memory_space<vmem>>, vector<32x8xf32>
    %cst_5 = arith.constant dense<0.000000e+00> : vector<32x128xf32>
    %5 = tpu.matmul %4, %0, %cst_5 {dimension_numbers = #tpu.dot_dimension_numbers<[1], [0], [0], [1], [0, 0, 1, 1], [], []>} : vector<32x8xf32>, vector<8x128xf32>, vector<32x128xf32> -> vector<32x128xf32>
    %6 = arith.addf %3, %5 : vector<32x128xf32>
    %7 = vector.extract_strided_slice %6 {offsets = [0, 0], sizes = [8, 128], strides = [1, 1]} : vector<32x128xf32> to vector<8x128xf32>
    %cst_6 = arith.constant 0.000000e+00 : f32
    %8 = vector.broadcast %cst_6 : f32 to vector<8x128xf32>
    %9 = arith.subf %8, %7 : vector<8x128xf32>
    %10 = math.exp %9 : vector<8x128xf32>
    %cst_7 = arith.constant 1.000000e+00 : f32
    %11 = vector.broadcast %cst_7 : f32 to vector<8x128xf32>
    %12 = arith.addf %11, %10 : vector<8x128xf32>
    %cst_8 = arith.constant 1.000000e+00 : f32
    %13 = vector.broadcast %cst_8 : f32 to vector<8x128xf32>
    %14 = arith.divf %13, %12 : vector<8x128xf32>
    %15 = vector.extract_strided_slice %6 {offsets = [8, 0], sizes = [8, 128], strides = [1, 1]} : vector<32x128xf32> to vector<8x128xf32>
    %cst_9 = arith.constant 0.000000e+00 : f32
    %16 = vector.broadcast %cst_9 : f32 to vector<8x128xf32>
    %17 = arith.subf %16, %15 : vector<8x128xf32>
    %18 = math.exp %17 : vector<8x128xf32>
    %cst_10 = arith.constant 1.000000e+00 : f32
    %19 = vector.broadcast %cst_10 : f32 to vector<8x128xf32>
    %20 = arith.addf %19, %18 : vector<8x128xf32>
    %cst_11 = arith.constant 1.000000e+00 : f32
    %21 = vector.broadcast %cst_11 : f32 to vector<8x128xf32>
    %22 = arith.divf %21, %20 : vector<8x128xf32>
    %23 = vector.extract_strided_slice %6 {offsets = [16, 0], sizes = [8, 128], strides = [1, 1]} : vector<32x128xf32> to vector<8x128xf32>
    %24 = math.tanh %23 : vector<8x128xf32>
    %25 = vector.extract_strided_slice %6 {offsets = [24, 0], sizes = [8, 128], strides = [1, 1]} : vector<32x128xf32> to vector<8x128xf32>
    %cst_12 = arith.constant 0.000000e+00 : f32
    %26 = vector.broadcast %cst_12 : f32 to vector<8x128xf32>
    %27 = arith.subf %26, %25 : vector<8x128xf32>
    %28 = math.exp %27 : vector<8x128xf32>
    %cst_13 = arith.constant 1.000000e+00 : f32
    %29 = vector.broadcast %cst_13 : f32 to vector<8x128xf32>
    %30 = arith.addf %29, %28 : vector<8x128xf32>
    %cst_14 = arith.constant 1.000000e+00 : f32
    %31 = vector.broadcast %cst_14 : f32 to vector<8x128xf32>
    %32 = arith.divf %31, %30 : vector<8x128xf32>
    %33 = arith.mulf %22, %1 : vector<8x128xf32>
    %34 = arith.mulf %14, %24 : vector<8x128xf32>
    %35 = arith.addf %33, %34 : vector<8x128xf32>
    %36 = math.tanh %35 : vector<8x128xf32>
    %37 = arith.mulf %32, %36 : vector<8x128xf32>
    %c1 = arith.constant 1 : index
    %c0_15 = arith.constant 0 : index
    %c0_16 = arith.constant 0 : index
    %38 = vector.load %arg1[%c1, %c0_15, %c0_16] : memref<2x32x128xf32, #tpu.memory_space<vmem>>, vector<1x32x128xf32>
    %39 = vector.shape_cast %38 : vector<1x32x128xf32> to vector<32x128xf32>
    %c0_17 = arith.constant 0 : index
    %c0_18 = arith.constant 0 : index
    %40 = vector.load %arg2[%c0_17, %c0_18] : memref<32x8xf32, #tpu.memory_space<vmem>>, vector<32x8xf32>
    %cst_19 = arith.constant dense<0.000000e+00> : vector<32x128xf32>
    %41 = tpu.matmul %40, %37, %cst_19 {dimension_numbers = #tpu.dot_dimension_numbers<[1], [0], [0], [1], [0, 0, 1, 1], [], []>} : vector<32x8xf32>, vector<8x128xf32>, vector<32x128xf32> -> vector<32x128xf32>
    %42 = arith.addf %39, %41 : vector<32x128xf32>
    %43 = vector.extract_strided_slice %42 {offsets = [0, 0], sizes = [8, 128], strides = [1, 1]} : vector<32x128xf32> to vector<8x128xf32>
    %cst_20 = arith.constant 0.000000e+00 : f32
    %44 = vector.broadcast %cst_20 : f32 to vector<8x128xf32>
    %45 = arith.subf %44, %43 : vector<8x128xf32>
    %46 = math.exp %45 : vector<8x128xf32>
    %cst_21 = arith.constant 1.000000e+00 : f32
    %47 = vector.broadcast %cst_21 : f32 to vector<8x128xf32>
    %48 = arith.addf %47, %46 : vector<8x128xf32>
    %cst_22 = arith.constant 1.000000e+00 : f32
    %49 = vector.broadcast %cst_22 : f32 to vector<8x128xf32>
    %50 = arith.divf %49, %48 : vector<8x128xf32>
    %51 = vector.extract_strided_slice %42 {offsets = [8, 0], sizes = [8, 128], strides = [1, 1]} : vector<32x128xf32> to vector<8x128xf32>
    %cst_23 = arith.constant 0.000000e+00 : f32
    %52 = vector.broadcast %cst_23 : f32 to vector<8x128xf32>
    %53 = arith.subf %52, %51 : vector<8x128xf32>
    %54 = math.exp %53 : vector<8x128xf32>
    %cst_24 = arith.constant 1.000000e+00 : f32
    %55 = vector.broadcast %cst_24 : f32 to vector<8x128xf32>
    %56 = arith.addf %55, %54 : vector<8x128xf32>
    %cst_25 = arith.constant 1.000000e+00 : f32
    %57 = vector.broadcast %cst_25 : f32 to vector<8x128xf32>
    %58 = arith.divf %57, %56 : vector<8x128xf32>
    %59 = vector.extract_strided_slice %42 {offsets = [16, 0], sizes = [8, 128], strides = [1, 1]} : vector<32x128xf32> to vector<8x128xf32>
    %60 = math.tanh %59 : vector<8x128xf32>
    %61 = vector.extract_strided_slice %42 {offsets = [24, 0], sizes = [8, 128], strides = [1, 1]} : vector<32x128xf32> to vector<8x128xf32>
    %cst_26 = arith.constant 0.000000e+00 : f32
    %62 = vector.broadcast %cst_26 : f32 to vector<8x128xf32>
    %63 = arith.subf %62, %61 : vector<8x128xf32>
    %64 = math.exp %63 : vector<8x128xf32>
    %cst_27 = arith.constant 1.000000e+00 : f32
    %65 = vector.broadcast %cst_27 : f32 to vector<8x128xf32>
    %66 = arith.addf %65, %64 : vector<8x128xf32>
    %cst_28 = arith.constant 1.000000e+00 : f32
    %67 = vector.broadcast %cst_28 : f32 to vector<8x128xf32>
    %68 = arith.divf %67, %66 : vector<8x128xf32>
    %69 = arith.mulf %58, %35 : vector<8x128xf32>
    %70 = arith.mulf %50, %60 : vector<8x128xf32>
    %71 = arith.addf %69, %70 : vector<8x128xf32>
    %72 = math.tanh %71 : vector<8x128xf32>
    %73 = arith.mulf %68, %72 : vector<8x128xf32>
    %c0_29 = arith.constant 0 : index
    %c0_30 = arith.constant 0 : index
    %74 = vector.load %arg3[%c0_29, %c0_30] : memref<16x8xf32, #tpu.memory_space<vmem>>, vector<16x8xf32>
    %cst_31 = arith.constant dense<0.000000e+00> : vector<16x128xf32>
    %75 = tpu.matmul %74, %73, %cst_31 {dimension_numbers = #tpu.dot_dimension_numbers<[1], [0], [0], [1], [0, 0, 1, 1], [], []>} : vector<16x8xf32>, vector<8x128xf32>, vector<16x128xf32> -> vector<16x128xf32>
    %c0_32 = arith.constant 0 : index
    %c0_33 = arith.constant 0 : index
    %76 = vector.load %arg4[%c0_32, %c0_33] : memref<16x1xf32, #tpu.memory_space<vmem>>, vector<16x1xf32>
    %77 = vector.broadcast %76 : vector<16x1xf32> to vector<16x128xf32>
    %78 = arith.addf %75, %77 : vector<16x128xf32>
    %c0_34 = arith.constant 0 : index
    %c0_35 = arith.constant 0 : index
    %79 = vector.load %arg5[%c0_34, %c0_35] : memref<16x128xf32, #tpu.memory_space<vmem>>, vector<16x128xf32>
    tpu.vector_store %arg5[%c0_34, %c0_35], %78 {strides = array<i32>} : memref<16x128xf32, #tpu.memory_space<vmem>>, vector<16x128xf32>,
    return
  }
  func.func @transform_0(%arg0: i32) -> (i32, i32, i32) {
    %c0_i32 = arith.constant 0 : i32
    %c0_i32_0 = arith.constant 0 : i32
    %c0_i32_1 = arith.constant 0 : i32
    %c0_i32_2 = arith.constant 0 : i32
    return %c0_i32, %c0_i32_0, %c0_i32_1 : i32, i32, i32
  }
  func.func @transform_1(%arg0: i32) -> (i32, i32) {
    %c0_i32 = arith.constant 0 : i32
    %c0_i32_0 = arith.constant 0 : i32
    %c0_i32_1 = arith.constant 0 : i32
    return %c0_i32, %c0_i32_0 : i32, i32
  }
  func.func @transform_2(%arg0: i32) -> (i32, i32) {
    %c0_i32 = arith.constant 0 : i32
    %c0_i32_0 = arith.constant 0 : i32
    %c0_i32_1 = arith.constant 0 : i32
    return %c0_i32, %c0_i32_0 : i32, i32
  }
  func.func @transform_3(%arg0: i32) -> (i32, i32) {
    %c0_i32 = arith.constant 0 : i32
    %c0_i32_0 = arith.constant 0 : i32
    %c0_i32_1 = arith.constant 0 : i32
    return %c0_i32, %c0_i32_0 : i32, i32
  }
  func.func @transform_4(%arg0: i32) -> (i32, i32) {
    %c0_i32 = arith.constant 0 : i32
    %c0_i32_0 = arith.constant 0 : i32
    %c0_i32_1 = arith.constant 0 : i32
    return %c0_i32, %c0_i32_0 : i32, i32
  }
}

</mosaic_0001>

<bundles_post_ra>
// kernel: nplm2_forward.1
= control target key start
LH: loop header
LB: loop body
LE: loop exit
PB: predicated region body
PF: predicated region fallthrough
CT: control target
= control target key end

     0   :  { %vm25_vm0 = vcmask 64512   ;;  %v453_v0 = vmov 0.0   ;;  %v454_v39 = vmov 0   ;;  %s544_s1 = inlined_call_operand.vmem [shape: f32[32,8], index: 1, kind: input, shape index: {}]   ;;  %s545_s0 = inlined_call_operand.vmem [shape: f32[2,32,128], index: 0, kind: input, shape index: {}]   ;;  %s546_s2 = inlined_call_operand.vmem [shape: f32[16,8], index: 2, kind: input, shape index: {}]   ;;  %s547_s3 = inlined_call_operand.vmem [shape: f32[16,1], index: 3, kind: input, shape index: {}]   ;;  %s548_s4 = inlined_call_operand.vmem [shape: f32[16,128], index: 4, kind: output, shape index: {}]  }
   0x1   :  { %397 = vmatprep.subr.mxu0 %v453_v0  ;;  %v21_v1 = vld [vmem:[%s544_s1] sm:$0xff]  ;;  %v22_v2 = vld [vmem:[%s544_s1 + $0x8] sm:$0xff]  ;;  %v23_v3 = vld [vmem:[%s544_s1 + $0x10] sm:$0xff]  ;;  %420 = vset.pattern.permute.xlu0 %v454_v39 }
   0x2   :  { %398 = vmatpush3.msra.mxu0 %v453_v0  ;;  %399 = vmatprep.mubr.msk.f32.mxu0 %vm25_vm0, %v21_v1  ;;  %v24_v4 = vld [vmem:[%s544_s1 + $0x18] sm:$0xff]  ;;  %v18_v5 = vld [vmem:[%s545_s0 + $0x8] sm:$0xff]  ;;  %v17_v6 = vld [vmem:[%s545_s0] sm:$0xff] }
   0x3   :  { %400 = vmatmul.mubr.msk.f32.vlgmr.msra.gmra.mrb[0].mxu0 %vm25_vm0, %v22_v2  ;;  %407 = vmatprep.mubr.msk.f32.mxu1 %vm25_vm0, %v21_v1  ;;  %v20_v11 = vld [vmem:[%s545_s0 + $0x18] sm:$0xff]  ;;  %v19_v20 = vld [vmem:[%s545_s0 + $0x10] sm:$0xff]  ;;  %v269_v38 = vld [vmem:[%s546_s2] sm:$0xff] }
   0x4   :  { %402 = vmatprep.mubr.msk.f32.mxu0 %vm25_vm0, %v23_v3  ;;  %v271_v40 = vld [vmem:[%s547_s3] sm:$0xff]  ;;  %v272_v41 = vld [vmem:[%s547_s3 + $0x8] sm:$0xff]  ;;  %v377_v48 = vld [vmem:[%s545_s0 + $0x38] sm:$0xff] }
   0x5   :  { %275 = vperm.xlu0 %420, %v271_v40   ;;  %v375_v42 = vld [vmem:[%s545_s0 + $0x28] sm:$0xff]  ;;  %v374_v43 = vld [vmem:[%s545_s0 + $0x20] sm:$0xff]  ;;  %v376_v57 = vld [vmem:[%s545_s0 + $0x30] sm:$0xff] }
   0x7   :  { %403 = vmatmul.mubr.msk.f32.gmra.mrb[2].mxu0 %vm25_vm0, %v24_v4 }
   0x8   :  { %415 = vmatprep.mubr.msk.f32.mxu0 %vm25_vm0, %v269_v38 }
   0x9   :  { %280 = vperm.xlu0 %420, %v272_v41  }
  0xd6   :  { %v401_v7 = vpop.f32.mrb[0].mxu0 }
  0xd7   :  { %v124_v8 = vadd.f32 %v401_v7, %v18_v5  ;;  %v104_v9 = vpop.f32.mrb[1].mxu0 }
  0xd8   :  { %v123_v10 = vadd.f32 %v104_v9, %v17_v6 }
  0xd9   :  { %v133_v12 = vsub.f32 0.0, %v124_v8 }
  0xda   :  { %v127_v13 = vsub.f32 0.0, %v123_v10  ;;  %v404_v14 = vpop.f32.mrb[2].mxu0 }
  0xdb   :  { %v134_v15 = vmul.f32 1.442695, %v133_v12  ;;  %v126_v16 = vadd.f32 %v404_v14, %v20_v11  ;;  %v114_v17 = vpop.f32.mrb[3].mxu0  ;;  %v270_v11 = vld [vmem:[%s546_s2 + $0x8] sm:$0xff]  ;;  %v276_v12 = vpop.permute.xlu0 %275 }
  0xdc   :  { %v128_v18 = vmul.f32 1.442695, %v127_v13  ;;  %v125_v22 = vadd.f32 %v114_v17, %v19_v20 }
  0xdd   :  { %421 = vpow2.f32 %v134_v15  ;;  %v140_v19 = vsub.f32 0.0, %v126_v16 }
  0xde   :  { %423 = vpow2.f32 %v128_v18 }
  0xdf   :  { %v141_v21 = vmul.f32 1.442695, %v140_v19  ;;  %v281_v14 = vpop.permute.xlu0 %280 }
  0xe1   :  { %425 = vpow2.f32 %v141_v21 }
  0xe2   :  { %427 = vtanh.f32 %v125_v22 }
  0xe7   :  { %v422_v23 = vpop.eup %421 }
  0xe8   :  { %v424_v24 = vpop.eup %423  ;;  %v136_v25 = vadd.f32 1.0, %v422_v23 }
  0xe9   :  { %v130_v26 = vadd.f32 1.0, %v424_v24 }
  0xea   :  { %429 = vrcp.f32 %v136_v25 }
  0xeb   :  { %431 = vrcp.f32 %v130_v26  ;;  %v426_v27 = vpop.eup %425 }
  0xec   :  { %v428_v28 = vpop.eup %427  ;;  %v143_v30 = vadd.f32 1.0, %v426_v27 }
  0xee   :  { %433 = vrcp.f32 %v143_v30 }
  0xf4   :  { %v430_v29 = vpop.eup %429 }
  0xf5   :  { %v432_v31 = vpop.eup %431  ;;  %v146_v32 = vmul.f32 0.0, %v430_v29 }
  0xf6   :  { %v147_v33 = vmul.f32 %v432_v31, %v428_v28 }
  0xf8   :  { %v148_v34 = vadd.f32 %v147_v33, %v146_v32  ;;  %v434_v35 = vpop.eup %433 }
  0xfa   :  { %435 = vtanh.f32 %v148_v34 }
 0x104   :  { %v436_v36 = vpop.eup %435 }
 0x105   :  { %v150_v37 = vmul.f32 %v436_v36, %v434_v35 }
 0x107   :  { %405 = vmatprep.subr.mxu1 %v150_v37 }
 0x108   :  { %406 = vmatpush3.msra.mxu1 %v150_v37 }
 0x109   :  { %408 = vmatmul.mubr.msk.f32.vlgmr.msra.gmra.mrb[0].mxu1 %vm25_vm0, %v22_v2 }
 0x10a   :  { %410 = vmatprep.mubr.msk.f32.mxu1 %vm25_vm0, %v23_v3 }
 0x10d   :  { %411 = vmatmul.mubr.msk.f32.gmra.mrb[2].mxu1 %vm25_vm0, %v24_v4 }
 0x1dc   :  { %v409_v44 = vpop.f32.mrb[0].mxu1 }
 0x1dd   :  { %v242_v45 = vadd.f32 %v409_v44, %v375_v42  ;;  %v222_v46 = vpop.f32.mrb[1].mxu1 }
 0x1de   :  { %v241_v47 = vadd.f32 %v374_v43, %v222_v46 }
 0x1df   :  { %v251_v49 = vsub.f32 0.0, %v242_v45 }
 0x1e0   :  { %v245_v50 = vsub.f32 0.0, %v241_v47  ;;  %v412_v51 = vpop.f32.mrb[2].mxu1 }
 0x1e1   :  { %v252_v52 = vmul.f32 1.442695, %v251_v49  ;;  %v244_v53 = vadd.f32 %v412_v51, %v377_v48  ;;  %v232_v54 = vpop.f32.mrb[3].mxu1 }
 0x1e2   :  { %v246_v55 = vmul.f32 1.442695, %v245_v50  ;;  %v243_v59 = vadd.f32 %v376_v57, %v232_v54 }
 0x1e3   :  { %437 = vpow2.f32 %v252_v52  ;;  %v258_v56 = vsub.f32 0.0, %v244_v53 }
 0x1e4   :  { %439 = vpow2.f32 %v246_v55 }
 0x1e5   :  { %v259_v58 = vmul.f32 1.442695, %v258_v56 }
 0x1e7   :  { %441 = vpow2.f32 %v259_v58 }
 0x1e8   :  { %443 = vtanh.f32 %v243_v59 }
 0x1ed   :  { %v438_v60 = vpop.eup %437 }
 0x1ee   :  { %v440_v61 = vpop.eup %439  ;;  %v254_v62 = vadd.f32 1.0, %v438_v60 }
 0x1ef   :  { %v248_v63 = vadd.f32 1.0, %v440_v61 }
 0x1f0   :  { %445 = vrcp.f32 %v254_v62 }
 0x1f1   :  { %447 = vrcp.f32 %v248_v63  ;;  %v442_v0 = vpop.eup %441 }
 0x1f2   :  { %v444_v1 = vpop.eup %443  ;;  %v261_v3 = vadd.f32 1.0, %v442_v0 }
 0x1f4   :  { %449 = vrcp.f32 %v261_v3 }
 0x1fa   :  { %v446_v2 = vpop.eup %445 }
 0x1fb   :  { %v448_v4 = vpop.eup %447  ;;  %v264_v5 = vmul.f32 %v446_v2, %v148_v34 }
 0x1fc   :  { %v265_v6 = vmul.f32 %v448_v4, %v444_v1 }
 0x1fe   :  { %v266_v7 = vadd.f32 %v265_v6, %v264_v5  ;;  %v450_v8 = vpop.eup %449 }
 0x200   :  { %451 = vtanh.f32 %v266_v7 }
 0x20a   :  { %v452_v9 = vpop.eup %451 }
 0x20b   :  { %v268_v10 = vmul.f32 %v452_v9, %v450_v8 }
 0x20d   :  { %413 = vmatprep.subr.mxu0 %v268_v10 }
 0x20e   :  { %414 = vmatpush3.msra.mxu0 %v268_v10 }
 0x20f   :  { %416 = vmatmul.mubr.msk.f32.vlgmr.msra.gmra.mrb[4].mxu0 %vm25_vm0, %v270_v11 }
 0x2e2   :  { %v417_v13 = vpop.f32.mrb[4].mxu0 }
 0x2e3   :  { %v361_v15 = vadd.f32 %v417_v13, %v281_v14  ;;  %v355_v16 = vpop.f32.mrb[5].mxu0 }
 0x2e4   :  { %v356_v17 = vadd.f32 %v355_v16, %v276_v12 }
 0x2e5   :  { %365 = vst [vmem:[%s548_s4 + $0x8] sm:$0xff] %v361_v15 }
 0x2e6   :  { %364 = vst [vmem:[%s548_s4] sm:$0xff] %v356_v17 }

</bundles_post_ra>
